<compile_context>
chip_gen: v5e
topology: v5e:2x2
jax: 0.10.0
libtpu: 0.0.40
codegen_flags: <defaults>
</compile_context>

<pallas_src>
import functools

import jax
import jax.numpy as jnp
from jax.experimental import pallas as pl
from jax.experimental.pallas import tpu as pltpu

NEG_SLOPE = 0.01                       # PyTorch LeakyReLU default
FUSED_SLOPE = NEG_SLOPE * NEG_SLOPE    # LeakyReLU(Dropout(LeakyReLU(x))), eval mode


def _leaky(x, slope=NEG_SLOPE):
    return jnp.where(x > 0, x, slope * x)


def esnn_kernel(x_ref,
                wg0_ref, bg0_ref, wg1_ref, bg1_ref,
                wio_ref, bio_ref,
                wc0_ref, bc0_ref, wlct_ref, blc_ref,
                rt_ref, io1_ref, io2_ref, *, tile_b):
    """One batch-tile of the full ESNN forward pass.

    x_ref holds both siamese branches stacked on the sublane axis:
    rows [0, tile_b) are the x1 tile, rows [tile_b, 2*tile_b) are the x2 tile,
    so every G-layer matmul runs once for both branches.
    """
    x = x_ref[...].astype(jnp.float32)

    # Read each bias exactly once (JAX does not CSE broadcast_in_dim).
    bg0 = bg0_ref[...]
    bg1 = bg1_ref[...]
    bio = bio_ref[...]
    bc0 = bc0_ref[...]
    blc = blc_ref[...]
    wlc_row = wlct_ref[...]                       # (1, C0): last_C weight as a row

    # --- forward_G (both branches at once) -----------------------------------
    # Each G pair is Linear -> LeakyReLU -> Dropout(id) -> LeakyReLU; the two
    # LeakyReLUs fuse to a single sweep with slope NEG_SLOPE**2.
    z = jnp.dot(x, wg0_ref[...], preferred_element_type=jnp.float32) + bg0
    y = _leaky(z, FUSED_SLOPE)
    z = jnp.dot(y, wg1_ref[...], preferred_element_type=jnp.float32) + bg1
    y = _leaky(z, FUSED_SLOPE)
    inner = jnp.dot(y, wio_ref[...], preferred_element_type=jnp.float32) + bio

    e1, e2 = y[:tile_b], y[tile_b:]               # sublane-aligned static slices
    io1_ref[...] = inner[:tile_b].astype(io1_ref.dtype)
    io2_ref[...] = inner[tile_b:].astype(io2_ref.dtype)

    # --- forward_C on |e1 - e2| -----------------------------------------------
    absdiff = jnp.abs(e1 - e2)
    h = _leaky(jnp.dot(absdiff, wc0_ref[...],
                       preferred_element_type=jnp.float32) + bc0)
    # last_C has one output unit: VPU multiply + XLU lane reduction beats an
    # MXU push/drain for a single useful lane.
    rt_logit = jnp.sum(h * wlc_row, axis=-1, keepdims=True) + blc
    rt_ref[...] = jax.nn.sigmoid(rt_logit).astype(rt_ref.dtype)


def init_linear(key, fan_in, fan_out):
    """PyTorch nn.Linear default init: U(-1/sqrt(fan_in), 1/sqrt(fan_in))."""
    kw, kb = jax.random.split(key)
    bound = 1.0 / float(fan_in) ** 0.5
    w = jax.random.uniform(kw, (fan_in, fan_out), jnp.float32, -bound, bound)
    b = jax.random.uniform(kb, (1, fan_out), jnp.float32, -bound, bound)
    return w, b


def make_params(key, input_shape, output_shape, networklayers=(13, 13)):
    keys = jax.random.split(key, 5)
    g0, g1 = networklayers
    wg0, bg0 = init_linear(keys[0], input_shape, g0)
    wg1, bg1 = init_linear(keys[1], g0, g1)
    wio, bio = init_linear(keys[2], g1, output_shape)
    wc0, bc0 = init_linear(keys[3], g1, networklayers[0])   # first (only) C layer
    wlc, blc = init_linear(keys[4], networklayers[0], 1)    # last_C -> 1 unit
    return (wg0, bg0, wg1, bg1, wio, bio, wc0, bc0, wlc, blc)


def _pick_tile(b):
    """Batch tile: a multiple of 8 dividing b, capped at 512 rows, preferring
    >= 4 grid steps (>= 2 per v7x TensorCore) so double-buffering overlaps."""
    if b <= 32:
        return b
    cap = min(512, b)
    tile = b
    for cand in range(cap - cap % 8, 7, -8):
        if b % cand == 0:
            tile = cand
            break
    while b // tile < 4 and tile % 16 == 0 and tile >= 128:
        tile //= 2
    return tile


@functools.partial(jax.jit, static_argnames=("tile_b",))
def esnn_forward(x1, x2, params, *, tile_b=None):
    B, F = x1.shape
    (wg0, bg0, wg1, bg1, wio, bio, wc0, bc0, wlc, blc) = params
    H1 = wg0.shape[1]
    H2 = wg1.shape[1]
    C_out = wio.shape[1]
    C0 = wc0.shape[1]

    # Pad the batch to a multiple of 8 so sublane slices stay aligned and the
    # batch tile satisfies the (8, 128) block constraint.
    B_pad = -(-B // 8) * 8
    if B_pad != B:
        pad = B_pad - B
        x1 = jnp.pad(x1, ((0, pad), (0, 0)))
        x2 = jnp.pad(x2, ((0, pad), (0, 0)))

    if tile_b is None:
        tile_b = _pick_tile(B_pad)
    assert B_pad % tile_b == 0, "padded batch must be a multiple of the batch tile"
    nb = B_pad // tile_b

    # Stack the siamese branches per tile in the wrapper (one cheap XLA layout
    # op that overlaps with the kernel) -> no in-kernel concat / extra copy.
    x1r = x1.reshape(nb, tile_b, F)
    x2r = x2.reshape(nb, tile_b, F)
    xs = jnp.concatenate([x1r, x2r], axis=1).reshape(nb * 2 * tile_b, F)

    wlc_row = wlc.reshape(1, C0)                  # last_C weight as a row vector

    kernel = functools.partial(esnn_kernel, tile_b=tile_b)

    full_spec = lambda shape: pl.BlockSpec(shape, lambda i: (0, 0))
    in_specs = [
        pl.BlockSpec((2 * tile_b, F), lambda i: (i, 0)),     # stacked x1|x2 tile
        full_spec((F, H1)),     full_spec((1, H1)),          # G layer 0
        full_spec((H1, H2)),    full_spec((1, H2)),          # G layer 1
        full_spec((H2, C_out)), full_spec((1, C_out)),       # inner_output
        full_spec((H2, C0)),    full_spec((1, C0)),          # C layer 0
        full_spec((1, C0)),     full_spec((1, 1)),           # last_C row + bias
    ]
    out_specs = (
        pl.BlockSpec((tile_b, 1), lambda i: (i, 0)),         # r_t
        pl.BlockSpec((tile_b, C_out), lambda i: (i, 0)),     # inner_output1
        pl.BlockSpec((tile_b, C_out), lambda i: (i, 0)),     # inner_output2
    )
    out_shape = (
        jax.ShapeDtypeStruct((B_pad, 1), jnp.float32),
        jax.ShapeDtypeStruct((B_pad, C_out), jnp.float32),
        jax.ShapeDtypeStruct((B_pad, C_out), jnp.float32),
    )

    n_param = sum(int(p.size) for p in params)
    cost = pl.CostEstimate(
        flops=int(4 * B_pad * (F * H1 + H1 * H2 + H2 * C_out)
                  + 2 * B_pad * (H2 * C0 + C0)),
        transcendentals=int(B_pad),
        bytes_accessed=int(4 * (2 * B_pad * F + B_pad * (1 + 2 * C_out) + n_param)),
    )

    rt, io1, io2 = pl.pallas_call(
        kernel,
        grid=(nb,),
        in_specs=in_specs,
        out_specs=out_specs,
        out_shape=out_shape,
        compiler_params=pltpu.CompilerParams(
            dimension_semantics=("parallel",),
            vmem_limit_bytes=32 * 1024 * 1024),
        cost_estimate=cost,
    )(xs, wg0, bg0, wg1, bg1, wio, bio, wc0, bc0, wlc_row, blc)

    if B_pad != B:
        rt, io1, io2 = rt[:B], io1[:B], io2[:B]
    return rt, io1, io2


def esnn_reference(x1, x2, params):
    """Pure-JAX reference matching the PyTorch forward (eval mode)."""
    (wg0, bg0, wg1, bg1, wio, bio, wc0, bc0, wlc, blc) = params

    def forward_g(x):
        y = x
        for w, b in ((wg0, bg0), (wg1, bg1)):
            y = _leaky(y @ w + b)     # LeakyReLU(Linear(y))
            y = _leaky(y)             # LeakyReLU(Dropout(y)), Dropout == id
        return y, y @ wio + bio

    e1, io1 = forward_g(x1)
    e2, io2 = forward_g(x2)
    absdiff = jnp.abs(e1 - e2)
    y = _leaky(absdiff @ wc0 + bc0)
    rt = jax.nn.sigmoid(y @ wlc + blc)
    return rt, io1, io2


if __name__ == "__main__":
    # Small, deterministic problem: batch=16, input feature dim=20,
    # networklayers=[13, 13] (PyTorch default), output_shape=4.
    B, F_IN, OUT = 16, 20, 4
    key = jax.random.PRNGKey(0)
    kx1, kx2, kp = jax.random.split(key, 3)

    x1 = jax.random.normal(kx1, (B, F_IN), jnp.float32)
    x2 = jax.random.normal(kx2, (B, F_IN), jnp.float32)
    params = make_params(kp, F_IN, OUT, networklayers=(13, 13))

    rt, io1, io2 = esnn_forward(x1, x2, params)
    jax.block_until_ready((rt, io1, io2))

    rt_ref, io1_ref, io2_ref = esnn_reference(x1, x2, params)
    assert rt.shape == (B, 1) and io1.shape == (B, OUT) and io2.shape == (B, OUT)
    assert jnp.allclose(rt, rt_ref, atol=1e-5, rtol=1e-5)
    assert jnp.allclose(io1, io1_ref, atol=1e-5, rtol=1e-5)
    assert jnp.allclose(io2, io2_ref, atol=1e-5, rtol=1e-5)

    print("KERNEL_OK")
</pallas_src>

<mosaic_0001>
module attributes {stable_mosaic.version = 11 : i64} {
  func.func @esnn_kernel(%arg0: i32, %arg1: memref<32x20xf32, #tpu.memory_space<vmem>>, %arg2: memref<20x13xf32, #tpu.memory_space<vmem>>, %arg3: memref<1x13xf32, #tpu.memory_space<vmem>>, %arg4: memref<13x13xf32, #tpu.memory_space<vmem>>, %arg5: memref<1x13xf32, #tpu.memory_space<vmem>>, %arg6: memref<13x4xf32, #tpu.memory_space<vmem>>, %arg7: memref<1x4xf32, #tpu.memory_space<vmem>>, %arg8: memref<13x13xf32, #tpu.memory_space<vmem>>, %arg9: memref<1x13xf32, #tpu.memory_space<vmem>>, %arg10: memref<1x13xf32, #tpu.memory_space<vmem>>, %arg11: memref<1x1xf32, #tpu.memory_space<vmem>>, %arg12: memref<16x1xf32, #tpu.memory_space<vmem>>, %arg13: memref<16x4xf32, #tpu.memory_space<vmem>>, %arg14: memref<16x4xf32, #tpu.memory_space<vmem>>) attributes {dimension_semantics = [#tpu.dimension_semantics<parallel>], iteration_bounds = array<i64: 1>, scalar_prefetch = 0 : i64, scratch_operands = 0 : i64, tpu.core_type = #tpu.core_type<tc>, window_params = [{transform_indices = @transform_0, window_bounds = array<i64: 32, 20>}, {pipeline_mode = #tpu.pipeline_mode<synchronous>, transform_indices = @transform_1, window_bounds = array<i64: 20, 13>}, {pipeline_mode = #tpu.pipeline_mode<synchronous>, transform_indices = @transform_2, window_bounds = array<i64: 1, 13>}, {pipeline_mode = #tpu.pipeline_mode<synchronous>, transform_indices = @transform_3, window_bounds = array<i64: 13, 13>}, {pipeline_mode = #tpu.pipeline_mode<synchronous>, transform_indices = @transform_4, window_bounds = array<i64: 1, 13>}, {pipeline_mode = #tpu.pipeline_mode<synchronous>, transform_indices = @transform_5, window_bounds = array<i64: 13, 4>}, {pipeline_mode = #tpu.pipeline_mode<synchronous>, transform_indices = @transform_6, window_bounds = array<i64: 1, 4>}, {pipeline_mode = #tpu.pipeline_mode<synchronous>, transform_indices = @transform_7, window_bounds = array<i64: 13, 13>}, {pipeline_mode = #tpu.pipeline_mode<synchronous>, transform_indices = @transform_8, window_bounds = array<i64: 1, 13>}, {pipeline_mode = #tpu.pipeline_mode<synchronous>, transform_indices = @transform_9, window_bounds = array<i64: 1, 13>}, {pipeline_mode = #tpu.pipeline_mode<synchronous>, transform_indices = @transform_10, window_bounds = array<i64: 1, 1>}, {transform_indices = @transform_11, window_bounds = array<i64: 16, 1>}, {transform_indices = @transform_12, window_bounds = array<i64: 16, 4>}, {transform_indices = @transform_13, window_bounds = array<i64: 16, 4>}]} {
    %c0 = arith.constant 0 : index
    %c0_0 = arith.constant 0 : index
    %0 = vector.load %arg1[%c0, %c0_0] : memref<32x20xf32, #tpu.memory_space<vmem>>, vector<32x20xf32>
    %c0_1 = arith.constant 0 : index
    %c0_2 = arith.constant 0 : index
    %1 = vector.load %arg3[%c0_1, %c0_2] : memref<1x13xf32, #tpu.memory_space<vmem>>, vector<1x13xf32>
    %c0_3 = arith.constant 0 : index
    %c0_4 = arith.constant 0 : index
    %2 = vector.load %arg5[%c0_3, %c0_4] : memref<1x13xf32, #tpu.memory_space<vmem>>, vector<1x13xf32>
    %c0_5 = arith.constant 0 : index
    %c0_6 = arith.constant 0 : index
    %3 = vector.load %arg7[%c0_5, %c0_6] : memref<1x4xf32, #tpu.memory_space<vmem>>, vector<1x4xf32>
    %c0_7 = arith.constant 0 : index
    %c0_8 = arith.constant 0 : index
    %4 = vector.load %arg9[%c0_7, %c0_8] : memref<1x13xf32, #tpu.memory_space<vmem>>, vector<1x13xf32>
    %c0_9 = arith.constant 0 : index
    %c0_10 = arith.constant 0 : index
    %5 = vector.load %arg11[%c0_9, %c0_10] : memref<1x1xf32, #tpu.memory_space<vmem>>, vector<1x1xf32>
    %c0_11 = arith.constant 0 : index
    %c0_12 = arith.constant 0 : index
    %6 = vector.load %arg10[%c0_11, %c0_12] : memref<1x13xf32, #tpu.memory_space<vmem>>, vector<1x13xf32>
    %c0_13 = arith.constant 0 : index
    %c0_14 = arith.constant 0 : index
    %7 = vector.load %arg2[%c0_13, %c0_14] : memref<20x13xf32, #tpu.memory_space<vmem>>, vector<20x13xf32>
    %cst = arith.constant dense<0.000000e+00> : vector<32x13xf32>
    %8 = tpu.matmul %0, %7, %cst {dimension_numbers = #tpu.dot_dimension_numbers<[1], [0], [0], [1], [0, 0, 1, 1], [], []>} : vector<32x20xf32>, vector<20x13xf32>, vector<32x13xf32> -> vector<32x13xf32>
    %9 = vector.broadcast %1 : vector<1x13xf32> to vector<32x13xf32>
    %10 = arith.addf %8, %9 : vector<32x13xf32>
    %cst_15 = arith.constant 0.000000e+00 : f32
    %11 = vector.broadcast %cst_15 : f32 to vector<32x13xf32>
    %12 = arith.cmpf ogt, %10, %11 : vector<32x13xf32>
    %cst_16 = arith.constant 9.99999974E-5 : f32
    %13 = vector.broadcast %cst_16 : f32 to vector<32x13xf32>
    %14 = arith.mulf %13, %10 : vector<32x13xf32>
    %15 = arith.select %12, %10, %14 : vector<32x13xi1>, vector<32x13xf32>
    %c0_17 = arith.constant 0 : index
    %c0_18 = arith.constant 0 : index
    %16 = vector.load %arg4[%c0_17, %c0_18] : memref<13x13xf32, #tpu.memory_space<vmem>>, vector<13x13xf32>
    %cst_19 = arith.constant dense<0.000000e+00> : vector<32x13xf32>
    %17 = tpu.matmul %15, %16, %cst_19 {dimension_numbers = #tpu.dot_dimension_numbers<[1], [0], [0], [1], [0, 0, 1, 1], [], []>} : vector<32x13xf32>, vector<13x13xf32>, vector<32x13xf32> -> vector<32x13xf32>
    %18 = vector.broadcast %2 : vector<1x13xf32> to vector<32x13xf32>
    %19 = arith.addf %17, %18 : vector<32x13xf32>
    %cst_20 = arith.constant 0.000000e+00 : f32
    %20 = vector.broadcast %cst_20 : f32 to vector<32x13xf32>
    %21 = arith.cmpf ogt, %19, %20 : vector<32x13xf32>
    %cst_21 = arith.constant 9.99999974E-5 : f32
    %22 = vector.broadcast %cst_21 : f32 to vector<32x13xf32>
    %23 = arith.mulf %22, %19 : vector<32x13xf32>
    %24 = arith.select %21, %19, %23 : vector<32x13xi1>, vector<32x13xf32>
    %c0_22 = arith.constant 0 : index
    %c0_23 = arith.constant 0 : index
    %25 = vector.load %arg6[%c0_22, %c0_23] : memref<13x4xf32, #tpu.memory_space<vmem>>, vector<13x4xf32>
    %cst_24 = arith.constant dense<0.000000e+00> : vector<32x4xf32>
    %26 = tpu.matmul %24, %25, %cst_24 {dimension_numbers = #tpu.dot_dimension_numbers<[1], [0], [0], [1], [0, 0, 1, 1], [], []>} : vector<32x13xf32>, vector<13x4xf32>, vector<32x4xf32> -> vector<32x4xf32>
    %27 = vector.broadcast %3 : vector<1x4xf32> to vector<32x4xf32>
    %28 = arith.addf %26, %27 : vector<32x4xf32>
    %29 = vector.extract_strided_slice %24 {offsets = [0, 0], sizes = [16, 13], strides = [1, 1]} : vector<32x13xf32> to vector<16x13xf32>
    %30 = vector.extract_strided_slice %24 {offsets = [16, 0], sizes = [16, 13], strides = [1, 1]} : vector<32x13xf32> to vector<16x13xf32>
    %31 = vector.extract_strided_slice %28 {offsets = [0, 0], sizes = [16, 4], strides = [1, 1]} : vector<32x4xf32> to vector<16x4xf32>
    %c0_25 = arith.constant 0 : index
    %c0_26 = arith.constant 0 : index
    %32 = vector.load %arg13[%c0_25, %c0_26] : memref<16x4xf32, #tpu.memory_space<vmem>>, vector<16x4xf32>
    tpu.vector_store %arg13[%c0_25, %c0_26], %31 {strides = array<i32>} : memref<16x4xf32, #tpu.memory_space<vmem>>, vector<16x4xf32>,
    %33 = vector.extract_strided_slice %28 {offsets = [16, 0], sizes = [16, 4], strides = [1, 1]} : vector<32x4xf32> to vector<16x4xf32>
    %c0_27 = arith.constant 0 : index
    %c0_28 = arith.constant 0 : index
    %34 = vector.load %arg14[%c0_27, %c0_28] : memref<16x4xf32, #tpu.memory_space<vmem>>, vector<16x4xf32>
    tpu.vector_store %arg14[%c0_27, %c0_28], %33 {strides = array<i32>} : memref<16x4xf32, #tpu.memory_space<vmem>>, vector<16x4xf32>,
    %35 = arith.subf %29, %30 : vector<16x13xf32>
    %36 = math.absf %35 : vector<16x13xf32>
    %c0_29 = arith.constant 0 : index
    %c0_30 = arith.constant 0 : index
    %37 = vector.load %arg8[%c0_29, %c0_30] : memref<13x13xf32, #tpu.memory_space<vmem>>, vector<13x13xf32>
    %cst_31 = arith.constant dense<0.000000e+00> : vector<16x13xf32>
    %38 = tpu.matmul %36, %37, %cst_31 {dimension_numbers = #tpu.dot_dimension_numbers<[1], [0], [0], [1], [0, 0, 1, 1], [], []>} : vector<16x13xf32>, vector<13x13xf32>, vector<16x13xf32> -> vector<16x13xf32>
    %39 = vector.broadcast %4 : vector<1x13xf32> to vector<16x13xf32>
    %40 = arith.addf %38, %39 : vector<16x13xf32>
    %cst_32 = arith.constant 0.000000e+00 : f32
    %41 = vector.broadcast %cst_32 : f32 to vector<16x13xf32>
    %42 = arith.cmpf ogt, %40, %41 : vector<16x13xf32>
    %cst_33 = arith.constant 0.00999999977 : f32
    %43 = vector.broadcast %cst_33 : f32 to vector<16x13xf32>
    %44 = arith.mulf %43, %40 : vector<16x13xf32>
    %45 = arith.select %42, %40, %44 : vector<16x13xi1>, vector<16x13xf32>
    %46 = vector.broadcast %6 : vector<1x13xf32> to vector<16x13xf32>
    %47 = arith.mulf %45, %46 : vector<16x13xf32>
    %cst_34 = arith.constant dense<0.000000e+00> : vector<16xf32>
    %48 = vector.multi_reduction <add>, %47, %cst_34 [1] : vector<16x13xf32> to vector<16xf32>
    %49 = vector.shape_cast %48 : vector<16xf32> to vector<16x1xf32>
    %50 = vector.broadcast %5 : vector<1x1xf32> to vector<16x1xf32>
    %51 = arith.addf %49, %50 : vector<16x1xf32>
    %52 = arith.negf %51 : vector<16x1xf32>
    %53 = math.exp %52 : vector<16x1xf32>
    %cst_35 = arith.constant 1.000000e+00 : f32
    %54 = vector.broadcast %cst_35 : f32 to vector<16x1xf32>
    %55 = arith.addf %54, %53 : vector<16x1xf32>
    %56 = arith.divf %54, %55 : vector<16x1xf32>
    %c0_36 = arith.constant 0 : index
    %c0_37 = arith.constant 0 : index
    %57 = vector.load %arg12[%c0_36, %c0_37] : memref<16x1xf32, #tpu.memory_space<vmem>>, vector<16x1xf32>
    tpu.vector_store %arg12[%c0_36, %c0_37], %56 {strides = array<i32>} : memref<16x1xf32, #tpu.memory_space<vmem>>, vector<16x1xf32>,
    return
  }
  func.func @transform_0(%arg0: i32) -> (i32, i32) {
    %c0_i32 = arith.constant 0 : i32
    %c0_i32_0 = arith.constant 0 : i32
    return %arg0, %c0_i32 : i32, i32
  }
  func.func @transform_1(%arg0: i32) -> (i32, i32) {
    %c0_i32 = arith.constant 0 : i32
    %c0_i32_0 = arith.constant 0 : i32
    %c0_i32_1 = arith.constant 0 : i32
    return %c0_i32, %c0_i32_0 : i32, i32
  }
  func.func @transform_2(%arg0: i32) -> (i32, i32) {
    %c0_i32 = arith.constant 0 : i32
    %c0_i32_0 = arith.constant 0 : i32
    %c0_i32_1 = arith.constant 0 : i32
    return %c0_i32, %c0_i32_0 : i32, i32
  }
  func.func @transform_3(%arg0: i32) -> (i32, i32) {
    %c0_i32 = arith.constant 0 : i32
    %c0_i32_0 = arith.constant 0 : i32
    %c0_i32_1 = arith.constant 0 : i32
    return %c0_i32, %c0_i32_0 : i32, i32
  }
  func.func @transform_4(%arg0: i32) -> (i32, i32) {
    %c0_i32 = arith.constant 0 : i32
    %c0_i32_0 = arith.constant 0 : i32
    %c0_i32_1 = arith.constant 0 : i32
    return %c0_i32, %c0_i32_0 : i32, i32
  }
  func.func @transform_5(%arg0: i32) -> (i32, i32) {
    %c0_i32 = arith.constant 0 : i32
    %c0_i32_0 = arith.constant 0 : i32
    %c0_i32_1 = arith.constant 0 : i32
    return %c0_i32, %c0_i32_0 : i32, i32
  }
  func.func @transform_6(%arg0: i32) -> (i32, i32) {
    %c0_i32 = arith.constant 0 : i32
    %c0_i32_0 = arith.constant 0 : i32
    %c0_i32_1 = arith.constant 0 : i32
    return %c0_i32, %c0_i32_0 : i32, i32
  }
  func.func @transform_7(%arg0: i32) -> (i32, i32) {
    %c0_i32 = arith.constant 0 : i32
    %c0_i32_0 = arith.constant 0 : i32
    %c0_i32_1 = arith.constant 0 : i32
    return %c0_i32, %c0_i32_0 : i32, i32
  }
  func.func @transform_8(%arg0: i32) -> (i32, i32) {
    %c0_i32 = arith.constant 0 : i32
    %c0_i32_0 = arith.constant 0 : i32
    %c0_i32_1 = arith.constant 0 : i32
    return %c0_i32, %c0_i32_0 : i32, i32
  }
  func.func @transform_9(%arg0: i32) -> (i32, i32) {
    %c0_i32 = arith.constant 0 : i32
    %c0_i32_0 = arith.constant 0 : i32
    %c0_i32_1 = arith.constant 0 : i32
    return %c0_i32, %c0_i32_0 : i32, i32
  }
  func.func @transform_10(%arg0: i32) -> (i32, i32) {
    %c0_i32 = arith.constant 0 : i32
    %c0_i32_0 = arith.constant 0 : i32
    %c0_i32_1 = arith.constant 0 : i32
    return %c0_i32, %c0_i32_0 : i32, i32
  }
  func.func @transform_11(%arg0: i32) -> (i32, i32) {
    %c0_i32 = arith.constant 0 : i32
    %c0_i32_0 = arith.constant 0 : i32
    return %arg0, %c0_i32 : i32, i32
  }
  func.func @transform_12(%arg0: i32) -> (i32, i32) {
    %c0_i32 = arith.constant 0 : i32
    %c0_i32_0 = arith.constant 0 : i32
    return %arg0, %c0_i32 : i32, i32
  }
  func.func @transform_13(%arg0: i32) -> (i32, i32) {
    %c0_i32 = arith.constant 0 : i32
    %c0_i32_0 = arith.constant 0 : i32
    return %arg0, %c0_i32 : i32, i32
  }
}

</mosaic_0001>

<bundles_post_ra>
// kernel: esnn_forward.1
= control target key start
LH: loop header
LB: loop body
LE: loop exit
PB: predicated region body
PF: predicated region fallthrough
CT: control target
= control target key end

     0   :  { %vm72_vm0 = vcmask 1043456   ;;  %vm59_vm1 = vcmask 162816   ;;  %vm135_vm2 = vcmask 1044480   ;;  %vm122_vm4 = vcmask 105472   ;;  %s550_s1 = inlined_call_operand.vmem [shape: f32[20,13], index: 1, kind: input, shape index: {}]   ;;  %s551_s0 = inlined_call_operand.vmem [shape: f32[32,20], index: 0, kind: input, shape index: {}]   ;;  %s552_s2 = inlined_call_operand.vmem [shape: f32[1,13], index: 2, kind: input, shape index: {}]   ;;  %s553_s4 = inlined_call_operand.vmem [shape: f32[1,13], index: 4, kind: input, shape index: {}]   ;;  %s554_s3 = inlined_call_operand.vmem [shape: f32[13,13], index: 3, kind: input, shape index: {}]   ;;  %s555_s6 = inlined_call_operand.vmem [shape: f32[1,4], index: 6, kind: input, shape index: {}]   ;;  %s556_s5 = inlined_call_operand.vmem [shape: f32[13,4], index: 5, kind: input, shape index: {}]   ;;  %s557_s7 = inlined_call_operand.vmem [shape: f32[13,13], index: 7, kind: input, shape index: {}]   ;;  %s558_s8 = inlined_call_operand.vmem [shape: f32[1,13], index: 8, kind: input, shape index: {}]   ;;  %s559_s9 = inlined_call_operand.vmem [shape: f32[1,13], index: 9, kind: input, shape index: {}]   ;;  %s560_s12 = inlined_call_operand.vmem [shape: f32[16,4], index: 12, kind: output, shape index: {1}]   ;;  %s561_s10 = inlined_call_operand.<no memory space> [shape: f32[1,1], index: 10, kind: input, shape index: {}]   ;;  %s562_s13 = inlined_call_operand.vmem [shape: f32[16,4], index: 13, kind: output, shape index: {2}]   ;;  %s563_s11 = inlined_call_operand.vmem [shape: f32[16,1], index: 11, kind: output, shape index: {0}]  }
   0x1   :  { %v55_v0 = vld [vmem:[%s550_s1 + $0x10] sm:$0xf]  ;;  %v54_v1 = vld [vmem:[%s550_s1 + $0x8] sm:$0xff]  ;;  %v53_v2 = vld [vmem:[%s550_s1] sm:$0xff]  ;;  %vm229_vm12 = vcmask 31744   ;;  %v19_v54 = vstv %s561_s10 }
   0x2   :  { %350 = vmatpush.msk.msra.mxu0 %vm72_vm0, %v55_v0  ;;  %v43_v3 = vld [vmem:[%s551_s0] sm:$0xff]  ;;  %v44_v4 = vld [vmem:[%s551_s0 + $0x8] sm:$0xff]  ;;  %v45_v5 = vld [vmem:[%s551_s0 + $0x10] sm:$0xff]  ;;  %20 = vst [vmem:[#allocation2] sm:$0x1] %v19_v54 }
   0x3   :  { %v46_v6 = vld [vmem:[%s551_s0 + $0x18] sm:$0xff]  ;;  %v118_v7 = vld [vmem:[%s554_s3 + $0x8] sm:$0x1f]  ;;  %v117_v8 = vld [vmem:[%s554_s3] sm:$0xff] }
   0x4   :  { %90 = vmatpush.msra.mxu0 %v54_v1  ;;  %355 = vmatpush.msk.msra.mxu1 %vm135_vm2, %v118_v7  ;;  %v370_v9 = vld [vmem:[%s552_s2] ss:$0 sm:$0xff]  ;;  %v181_v26 = vld [vmem:[%s556_s5 + $0x8] sm:$0x1f] }
   0x5   :  { %360 = vmatpush.msk.msra.mxu2 %vm135_vm2, %v181_v26  ;;  %v180_v27 = vld [vmem:[%s556_s5] sm:$0xff]  ;;  %v239_v28 = vld [vmem:[%s557_s7 + $0x8] sm:$0x1f] }
   0x6   :  { %91 = vmatpush.msra.mxu0 %v53_v2  ;;  %154 = vmatpush.msra.mxu1 %v117_v8  ;;  %v238_v29 = vld [vmem:[%s557_s7] sm:$0xff] }
   0x7   :  { %351 = vmatmul.msk.f32.vlgmr.msra.gmra.mxu0 %vm59_vm1, %v43_v3  ;;  %215 = vmatpush.msra.mxu2 %v180_v27  ;;  %v371_v30 = vld [vmem:[%s553_s4] ss:$0 sm:$0xff] }
   0x8   :  { %365 = vmatpush.msk.msra.mxu3 %vm135_vm2, %v239_v28  ;;  %v372_v51 = vld [vmem:[%s555_s6] ss:$0 sm:$0xff] }
   0x9   :  { %v373_v59 = vld [vmem:[%s558_s8] ss:$0 sm:$0xff] }
   0xa   :  { %267 = vmatpush.msra.mxu3 %v238_v29  ;;  %v374_v62 = vld [vmem:[%s559_s9] ss:$0 sm:$0xff] }
   0xf   :  { %352 = vmatmul.msk.f32.gmra.mxu0 %vm59_vm1, %v44_v4 }
  0x17   :  { %353 = vmatmul.msk.f32.gmra.mxu0 %vm59_vm1, %v45_v5 }
  0x1f   :  { %354 = vmatmul.msk.f32.gmra.mxu0 %vm59_vm1, %v46_v6  ;;  %vm335_vm1 = vcmask 7168  }
  0x84   :  { %v93_v10 = vpop.f32.mrf.mxu0 }
  0x85   :  { %v94_v11 = vadd.f32 %v370_v9, %v93_v10 }
  0x87   :  { %v109_v12 = vmul.f32 0.0001, %v94_v11  ;;  %vm105_vm3 = vcmp.gt.f32.partialorder %v94_v11, 0.0 }
  0x89   :  { %v113_v13 = vsel %vm105_vm3, %v94_v11, %v109_v12  ;;  %v375_v11 = vld [vmem:[#allocation2] ss:$0 sm:$0xff] }
  0x8a   :  { %356 = vmatmul.msk.f32.vlgmr.msra.gmra.mxu1 %vm122_vm4, %v113_v13 }
  0x8c   :  { %v96_v14 = vpop.f32.mrf.mxu0 }
  0x8d   :  { %v97_v15 = vadd.f32 %v370_v9, %v96_v14 }
  0x8f   :  { %v110_v16 = vmul.f32 0.0001, %v97_v15  ;;  %vm106_vm5 = vcmp.gt.f32.partialorder %v97_v15, 0.0 }
  0x91   :  { %v114_v17 = vsel %vm106_vm5, %v97_v15, %v110_v16 }
  0x92   :  { %357 = vmatmul.msk.f32.gmra.mxu1 %vm122_vm4, %v114_v17 }
  0x94   :  { %v99_v18 = vpop.f32.mrf.mxu0 }
  0x95   :  { %v100_v19 = vadd.f32 %v370_v9, %v99_v18 }
  0x97   :  { %v111_v20 = vmul.f32 0.0001, %v100_v19  ;;  %vm107_vm6 = vcmp.gt.f32.partialorder %v100_v19, 0.0 }
  0x99   :  { %v115_v21 = vsel %vm107_vm6, %v100_v19, %v111_v20 }
  0x9a   :  { %358 = vmatmul.msk.f32.gmra.mxu1 %vm122_vm4, %v115_v21 }
  0x9c   :  { %v102_v22 = vpop.f32.mrf.mxu0 }
  0x9d   :  { %v103_v23 = vadd.f32 %v370_v9, %v102_v22 }
  0x9f   :  { %v112_v24 = vmul.f32 0.0001, %v103_v23  ;;  %vm108_vm7 = vcmp.gt.f32.partialorder %v103_v23, 0.0 }
  0xa1   :  { %v116_v25 = vsel %vm108_vm7, %v103_v23, %v112_v24 }
  0xa2   :  { %359 = vmatmul.msk.f32.gmra.mxu1 %vm122_vm4, %v116_v25 }
 0x107   :  { %v156_v31 = vpop.f32.mrf.mxu1 }
 0x108   :  { %v157_v32 = vadd.f32 %v371_v30, %v156_v31 }
 0x10a   :  { %v172_v33 = vmul.f32 0.0001, %v157_v32  ;;  %vm168_vm8 = vcmp.gt.f32.partialorder %v157_v32, 0.0 }
 0x10c   :  { %v176_v34 = vsel %vm168_vm8, %v157_v32, %v172_v33 }
 0x10d   :  { %361 = vmatmul.msk.f32.vlgmr.msra.gmra.mxu2 %vm122_vm4, %v176_v34 }
 0x10f   :  { %v159_v35 = vpop.f32.mrf.mxu1 }
 0x110   :  { %v160_v36 = vadd.f32 %v371_v30, %v159_v35 }
 0x112   :  { %v173_v37 = vmul.f32 0.0001, %v160_v36  ;;  %vm169_vm9 = vcmp.gt.f32.partialorder %v160_v36, 0.0 }
 0x114   :  { %v177_v38 = vsel %vm169_vm9, %v160_v36, %v173_v37 }
 0x115   :  { %362 = vmatmul.msk.f32.gmra.mxu2 %vm122_vm4, %v177_v38 }
 0x117   :  { %v162_v39 = vpop.f32.mrf.mxu1 }
 0x118   :  { %v163_v40 = vadd.f32 %v371_v30, %v162_v39 }
 0x11a   :  { %v174_v41 = vmul.f32 0.0001, %v163_v40  ;;  %vm170_vm10 = vcmp.gt.f32.partialorder %v163_v40, 0.0 }
 0x11c   :  { %v178_v42 = vsel %vm170_vm10, %v163_v40, %v174_v41 }
 0x11d   :  { %363 = vmatmul.msk.f32.gmra.mxu2 %vm122_vm4, %v178_v42  ;;  %v234_v43 = vsub.f32 %v176_v34, %v178_v42 }
 0x11f   :  { %v236_v44 = vand.u32 2147483647, %v234_v43  ;;  %v165_v45 = vpop.f32.mrf.mxu1 }
 0x120   :  { %v166_v46 = vadd.f32 %v371_v30, %v165_v45 }
 0x121   :  { %366 = vmatmul.msk.f32.vlgmr.msra.gmra.mxu3 %vm122_vm4, %v236_v44 }
 0x122   :  { %v175_v47 = vmul.f32 0.0001, %v166_v46  ;;  %vm171_vm11 = vcmp.gt.f32.partialorder %v166_v46, 0.0 }
 0x124   :  { %v179_v48 = vsel %vm171_vm11, %v166_v46, %v175_v47 }
 0x125   :  { %364 = vmatmul.msk.f32.gmra.mxu2 %vm122_vm4, %v179_v48  ;;  %v235_v49 = vsub.f32 %v177_v38, %v179_v48 }
 0x127   :  { %v237_v50 = vand.u32 2147483647, %v235_v49 }
 0x129   :  { %367 = vmatmul.msk.f32.gmra.mxu3 %vm122_vm4, %v237_v50 }
 0x190   :  { %v217_v52 = vpop.f32.mrf.mxu2 }
 0x191   :  { %v218_v53 = vadd.f32 %v372_v51, %v217_v52 }
 0x193   :  { %230 = vst.msk [vmem:[%s560_s12] sm:$0xff] %vm229_vm12, %v218_v53 }
 0x198   :  { %v220_v55 = vpop.f32.mrf.mxu2 }
 0x199   :  { %v221_v56 = vadd.f32 %v372_v51, %v220_v55 }
 0x19b   :  { %231 = vst.msk [vmem:[%s560_s12 + $0x8] sm:$0xff] %vm229_vm12, %v221_v56 }
 0x1a0   :  { %v223_v57 = vpop.f32.mrf.mxu2 }
 0x1a1   :  { %v224_v58 = vadd.f32 %v372_v51, %v223_v57 }
 0x1a3   :  { %232 = vst.msk [vmem:[%s562_s13] sm:$0xff] %vm229_vm12, %v224_v58 }
 0x1a4   :  { %v269_v60 = vpop.f32.mrf.mxu3 }
 0x1a5   :  { %v270_v61 = vadd.f32 %v373_v59, %v269_v60 }
 0x1a7   :  { %v277_v63 = vmul.f32 0.01, %v270_v61  ;;  %vm275_vm13 = vcmp.gt.f32.partialorder %v270_v61, 0.0 }
 0x1a8   :  { %v226_v0 = vpop.f32.mrf.mxu2 }
 0x1a9   :  { %v227_v1 = vadd.f32 %v372_v51, %v226_v0  ;;  %v279_v2 = vsel %vm275_vm13, %v270_v61, %v277_v63 }
 0x1aa   :  { %v284_v3 = vmul.f32 %v374_v62, %v279_v2 }
 0x1ab   :  { %233 = vst.msk [vmem:[%s562_s13 + $0x8] sm:$0xff] %vm229_vm12, %v227_v1 }
 0x1ac   :  { %v272_v4 = vpop.f32.mrf.mxu3  ;;  %v286_v5 = vsel %vm122_vm4, %v284_v3, 0.0 }
 0x1ad   :  { %v273_v6 = vadd.f32 %v373_v59, %v272_v4  ;;  %287 = vadd.xlane.f32.xlu0 %v286_v5 }
 0x1af   :  { %vm276_vm14 = vcmp.gt.f32.partialorder %v273_v6, 0.0  ;;  %v278_v7 = vmul.f32 0.01, %v273_v6 }
 0x1b1   :  { %v280_v8 = vsel %vm276_vm14, %v273_v6, %v278_v7 }
 0x1b2   :  { %v285_v9 = vmul.f32 %v374_v62, %v280_v8 }
 0x1b4   :  { %v289_v10 = vsel %vm122_vm4, %v285_v9, 0.0 }
 0x1b5   :  { %290 = vadd.xlane.f32.xlu0 %v289_v10 }
 0x220   :  { %v288_v12 = vpop.xlane.xlu0 %287 }
 0x221   :  { %v295_v13 = vadd.f32 %v375_v11, %v288_v12 }
 0x223   :  { %v368_v14 = vmul.f32 -1.442695, %v295_v13 }
 0x225   :  { %376 = vpow2.f32 %v368_v14 }
 0x228   :  { %v291_v15 = vpop.xlane.xlu0 %290 }
 0x229   :  { %v296_v16 = vadd.f32 %v375_v11, %v291_v15 }
 0x22b   :  { %v377_v17 = vpop.eup %376  ;;  %v369_v18 = vmul.f32 -1.442695, %v296_v16 }
 0x22c   :  { %v303_v19 = vadd.f32 1.0, %v377_v17 }
 0x22d   :  { %378 = vpow2.f32 %v369_v18 }
 0x22e   :  { %380 = vrcp.f32 %v303_v19  ;;  %v316_v25 = vand.u32 2147483648, %v303_v19  ;;  %v314_v27 = vand.u32 2147483647, %v303_v19  ;;  %vm310_vm0 = vweird.f32 %v303_v19 }
 0x230   :  { %v317_v30 = vor.u32 1.1754944e-38, %v316_v25  ;;  %vm315_vm3 = vcmp.eq.f32.partialorder %v314_v27, 8.507059e+37 }
 0x233   :  { %v379_v20 = vpop.eup %378 }
 0x234   :  { %v381_v21 = vpop.eup %380  ;;  %v304_v22 = vadd.f32 1.0, %v379_v20 }
 0x235   :  { %v306_v23 = vmul.f32 %v381_v21, %v303_v19  ;;  %vm311_vm15 = vweird.f32 %v381_v21 }
 0x236   :  { %382 = vrcp.f32 %v304_v22  ;;  %vm312_vm2 = vmor %vm310_vm0, %vm311_vm15  ;;  %v331_v35 = vand.u32 2147483648, %v304_v22  ;;  %v329_v37 = vand.u32 2147483647, %v304_v22  ;;  %vm325_vm5 = vweird.f32 %v304_v22 }
 0x237   :  { %v307_v24 = vsub.f32 1.0, %v306_v23 }
 0x238   :  { %v332_v39 = vor.u32 1.1754944e-38, %v331_v35  ;;  %vm330_vm7 = vcmp.eq.f32.partialorder %v329_v37, 8.507059e+37 }
 0x239   :  { %v308_v26 = vmul.f32 %v381_v21, %v307_v24 }
 0x23b   :  { %v309_v28 = vadd.f32 %v381_v21, %v308_v26 }
 0x23c   :  { %v383_v29 = vpop.eup %382 }
 0x23d   :  { %v313_v31 = vsel %vm312_vm2, %v381_v21, %v309_v28  ;;  %v321_v32 = vmul.f32 %v383_v29, %v304_v22  ;;  %vm326_vm4 = vweird.f32 %v383_v29 }
 0x23e   :  { %v318_v33 = vsel %vm315_vm3, %v317_v30, %v313_v31  ;;  %vm327_vm6 = vmor %vm325_vm5, %vm326_vm4 }
 0x23f   :  { %336 = vst.msk [vmem:[%s563_s11] sm:$0xff] %vm335_vm1, %v318_v33  ;;  %v322_v34 = vsub.f32 1.0, %v321_v32 }
 0x241   :  { %v323_v36 = vmul.f32 %v383_v29, %v322_v34 }
 0x243   :  { %v324_v38 = vadd.f32 %v383_v29, %v323_v36 }
 0x245   :  { %v328_v40 = vsel %vm327_vm6, %v383_v29, %v324_v38 }
 0x246   :  { %v333_v41 = vsel %vm330_vm7, %v332_v39, %v328_v40 }
 0x247   :  { %337 = vst.msk [vmem:[%s563_s11 + $0x8] sm:$0xff] %vm335_vm1, %v333_v41 }

</bundles_post_ra>
